<compile_context>
chip_gen: v7x
topology: tpu7x:2x2x1
jax: 0.10.0
libtpu: 0.0.40
codegen_flags: <defaults>
</compile_context>

<pallas_src>
import jax
import jax.numpy as jnp
from jax.experimental import pallas as pl
from jax.experimental.pallas import tpu as pltpu

_LANE = 128
_UNROLL_C_MAX = 32                       # unroll per-channel copies up to this C
_LANE_TILE_TARGET_BYTES = 2 * 1024 * 1024
_BLOCK_TARGET_BYTES = 4 * 1024 * 1024


def _round_up(x, m):
    return -(-x // m) * m


def _pick_lane_tile(c, lanes, itemsize):
    """Largest multiple-of-128 divisor of `lanes` with a (c, tile) slab under budget."""
    n = lanes // _LANE
    best = 1
    for m in range(1, n + 1):
        if n % m == 0 and c * _LANE * m * itemsize <= _LANE_TILE_TARGET_BYTES:
            best = m
    return _LANE * best


def _pick_batch_tile(n, block_bytes):
    """Largest divisor of n keeping the (tn, C, THW) block under budget."""
    best = 1
    for tn in range(1, n + 1):
        if n % tn == 0 and tn * block_bytes <= _BLOCK_TARGET_BYTES:
            best = tn
    return best


def _make_shuffle_kernel(C, groups, cpg):
    """out[:, i*g + j, :] = in[:, j*cpg + i, :] (pure sublane permutation)."""
    if C <= _UNROLL_C_MAX:
        # Unrolled static contiguous slices: always lowers, lane-dense stores.
        def kernel(x_ref, o_ref):
            for j in range(groups):
                for i in range(cpg):
                    oc = i * groups + j
                    ic = j * cpg + i
                    o_ref[:, oc:oc + 1, :] = x_ref[:, ic:ic + 1, :]
        return kernel

    # Large C: vectorized sublane permute via reshape/transpose on the block.
    def kernel(x_ref, o_ref):
        x = x_ref[...]
        b, _, lw = x.shape
        o_ref[...] = jnp.transpose(
            x.reshape(b, groups, cpg, lw), (0, 2, 1, 3)).reshape(b, C, lw)
    return kernel


def shuffle_block(x, groups):
    """Channel shuffle: [N,C,H,W] -> [N,g,C/g,H,W] -> [N,C/g,g,H,W] -> [N,C,H,W]."""
    N, C, H, W = x.shape
    if C % groups != 0:
        raise ValueError("C must be divisible by groups")
    cpg = C // groups
    if groups == 1 or cpg == 1:
        return x                              # shuffle is the identity

    orig_dtype = x.dtype
    itemsize = x.dtype.itemsize
    HW = H * W
    x2 = x.reshape(N, C, HW)

    # Pack sub-32-bit dtypes into uint32 lanes and pad the lane axis to a
    # multiple of 128: lane-dense unmasked stores, dtype-agnostic sublane shuffle.
    pack = max(1, 4 // itemsize)
    hw_pad = _round_up(HW, _LANE * pack)
    if hw_pad != HW:
        x2 = jnp.pad(x2, ((0, 0), (0, 0), (0, hw_pad - HW)))
    if pack > 1:
        x2 = jax.lax.bitcast_convert_type(
            x2.reshape(N, C, hw_pad // pack, pack), jnp.uint32)
    work = x2                                 # (N, C, lanes), 32-bit elements
    lanes = work.shape[-1]
    w_itemsize = 4

    # Tile selection: bound per-buffer VMEM, amortize per-step overhead.
    thw = _pick_lane_tile(C, lanes, w_itemsize)
    slab_bytes = C * thw * w_itemsize
    tn = _pick_batch_tile(N, slab_bytes)
    blk_bytes = tn * slab_bytes
    grid = (N // tn, lanes // thw)

    kernel = _make_shuffle_kernel(C, groups, cpg)

    out = pl.pallas_call(
        kernel,
        out_shape=jax.ShapeDtypeStruct((N, C, lanes), work.dtype),
        grid_spec=pl.GridSpec(
            grid=grid,
            in_specs=[pl.BlockSpec((tn, C, thw), lambda n, s: (n, 0, s))],
            out_specs=pl.BlockSpec((tn, C, thw), lambda n, s: (n, 0, s)),
        ),
        compiler_params=pltpu.CompilerParams(
            dimension_semantics=("parallel", "parallel"),
            # in + out, double-buffered, with headroom; capped so it stays
            # within the default scoped VMEM on every generation (incl. v7x).
            vmem_limit_bytes=int(min(max(8 * blk_bytes, 16 * 1024 * 1024),
                                     32 * 1024 * 1024)),
        ),
        cost_estimate=pl.CostEstimate(
            flops=0, transcendentals=0,
            bytes_accessed=int(2 * N * C * lanes * w_itemsize)),
    )(work)

    if pack > 1:
        out = jax.lax.bitcast_convert_type(out, orig_dtype)   # (N, C, lanes, pack)
        out = out.reshape(N, C, lanes * pack)
    if hw_pad != HW:
        out = out[:, :, :HW]
    return out.reshape(N, C, H, W)


def _reference(x, groups):
    N, C, H, W = x.shape
    return jnp.reshape(
        jnp.transpose(x.reshape(N, groups, C // groups, H, W), (0, 2, 1, 3, 4)),
        (N, C, H, W),
    )


if __name__ == "__main__":
    key = jax.random.PRNGKey(0)

    # Primary check: f32, H*W already a multiple of 128.
    N, C, H, W, groups = 2, 4, 16, 16, 2
    x = jax.random.normal(key, (N, C, H, W), dtype=jnp.float32)
    y = jax.block_until_ready(shuffle_block(x, groups))
    assert y.shape == (N, C, H, W)
    assert jnp.array_equal(y, _reference(x, groups)), "f32 mismatch vs reference"

    # Secondary check: bf16 (packed into uint32 lanes) with non-128-multiple H*W.
    k2 = jax.random.fold_in(key, 1)
    xb = jax.random.normal(k2, (2, 8, 10, 10), dtype=jnp.float32).astype(jnp.bfloat16)
    yb = jax.block_until_ready(shuffle_block(xb, 4))
    assert jnp.array_equal(yb, _reference(xb, 4)), "bf16 mismatch vs reference"

    print("KERNEL_OK")
</pallas_src>

<mosaic_0001>
module attributes {stable_mosaic.version = 11 : i64} {
  func.func @kernel(%arg0: i32, %arg1: i32, %arg2: memref<2x4x256xf32, #tpu.memory_space<vmem>>, %arg3: memref<2x4x256xf32, #tpu.memory_space<vmem>>) attributes {dimension_semantics = [#tpu.dimension_semantics<parallel>, #tpu.dimension_semantics<parallel>], iteration_bounds = array<i64: 1, 1>, scalar_prefetch = 0 : i64, scratch_operands = 0 : i64, tpu.core_type = #tpu.core_type<tc>, window_params = [{transform_indices = @transform_0, window_bounds = array<i64: 2, 4, 256>}, {transform_indices = @transform_1, window_bounds = array<i64: 2, 4, 256>}]} {
    %c0 = arith.constant 0 : index
    %c0_0 = arith.constant 0 : index
    %c0_1 = arith.constant 0 : index
    %0 = vector.load %arg2[%c0, %c0_0, %c0_1] : memref<2x4x256xf32, #tpu.memory_space<vmem>>, vector<2x1x256xf32>
    %c0_2 = arith.constant 0 : index
    %c0_3 = arith.constant 0 : index
    %c0_4 = arith.constant 0 : index
    %1 = vector.load %arg3[%c0_2, %c0_3, %c0_4] : memref<2x4x256xf32, #tpu.memory_space<vmem>>, vector<2x1x256xf32>
    tpu.vector_store %arg3[%c0_2, %c0_3, %c0_4], %0 {strides = array<i32>} : memref<2x4x256xf32, #tpu.memory_space<vmem>>, vector<2x1x256xf32>,
    %c0_5 = arith.constant 0 : index
    %c1 = arith.constant 1 : index
    %c0_6 = arith.constant 0 : index
    %2 = vector.load %arg2[%c0_5, %c1, %c0_6] : memref<2x4x256xf32, #tpu.memory_space<vmem>>, vector<2x1x256xf32>
    %c0_7 = arith.constant 0 : index
    %c2 = arith.constant 2 : index
    %c0_8 = arith.constant 0 : index
    %3 = vector.load %arg3[%c0_7, %c2, %c0_8] : memref<2x4x256xf32, #tpu.memory_space<vmem>>, vector<2x1x256xf32>
    tpu.vector_store %arg3[%c0_7, %c2, %c0_8], %2 {strides = array<i32>} : memref<2x4x256xf32, #tpu.memory_space<vmem>>, vector<2x1x256xf32>,
    %c0_9 = arith.constant 0 : index
    %c2_10 = arith.constant 2 : index
    %c0_11 = arith.constant 0 : index
    %4 = vector.load %arg2[%c0_9, %c2_10, %c0_11] : memref<2x4x256xf32, #tpu.memory_space<vmem>>, vector<2x1x256xf32>
    %c0_12 = arith.constant 0 : index
    %c1_13 = arith.constant 1 : index
    %c0_14 = arith.constant 0 : index
    %5 = vector.load %arg3[%c0_12, %c1_13, %c0_14] : memref<2x4x256xf32, #tpu.memory_space<vmem>>, vector<2x1x256xf32>
    tpu.vector_store %arg3[%c0_12, %c1_13, %c0_14], %4 {strides = array<i32>} : memref<2x4x256xf32, #tpu.memory_space<vmem>>, vector<2x1x256xf32>,
    %c0_15 = arith.constant 0 : index
    %c3 = arith.constant 3 : index
    %c0_16 = arith.constant 0 : index
    %6 = vector.load %arg2[%c0_15, %c3, %c0_16] : memref<2x4x256xf32, #tpu.memory_space<vmem>>, vector<2x1x256xf32>
    %c0_17 = arith.constant 0 : index
    %c3_18 = arith.constant 3 : index
    %c0_19 = arith.constant 0 : index
    %7 = vector.load %arg3[%c0_17, %c3_18, %c0_19] : memref<2x4x256xf32, #tpu.memory_space<vmem>>, vector<2x1x256xf32>
    tpu.vector_store %arg3[%c0_17, %c3_18, %c0_19], %6 {strides = array<i32>} : memref<2x4x256xf32, #tpu.memory_space<vmem>>, vector<2x1x256xf32>,
    return
  }
  func.func @transform_0(%arg0: i32, %arg1: i32) -> (i32, i32, i32) {
    %c0_i32 = arith.constant 0 : i32
    %c0_i32_0 = arith.constant 0 : i32
    return %arg0, %c0_i32, %arg1 : i32, i32, i32
  }
  func.func @transform_1(%arg0: i32, %arg1: i32) -> (i32, i32, i32) {
    %c0_i32 = arith.constant 0 : i32
    %c0_i32_0 = arith.constant 0 : i32
    return %arg0, %c0_i32, %arg1 : i32, i32, i32
  }
}

</mosaic_0001>

<bundles_post_ra>
// kernel: tpu_custom_call.1
= control target key start
LH: loop header
LB: loop body
LE: loop exit
PB: predicated region body
PF: predicated region fallthrough
CT: control target
= control target key end

     0   :  { %6 = vsyncpa [#allocation3], 0  ;;  %s190_s0 = inlined_call_operand.hbm [shape: f32[2,4,256], index: 0, kind: input, shape index: {}]   ;;  %s191_s1 = inlined_call_operand.hbm [shape: f32[2,4,256], index: 1, kind: output, shape index: {}]  }
   0x1   :  { %7 = vsyncpa [#allocation4], 0  ;;  %s126_s6 = smov [#allocation2]   ;;  %s78_s10 = scalar_lea.hbm %s190_s0, 256 }
   0x2   :  { %s13_s7 = sshll.u32 %s126_s6, 4  ;;  %p79_p0 = scmp.ne.s32.totalorder %s190_s0, %s78_s10  ;;  %s14_s7 = int_to_ptr.vmem [resolvable:$true] %s13_s7 }
   0x3   :  { %p82_p1 = scmp.lt.u32.totalorder %s78_s10, %s190_s0 }
   0x5   :  { %p84_p2 = pnand %p82_p1, %p79_p0 }
   0x7   :  { %87 = shalt.err (!%p84_p2)
}
   0x8   :  { %s88_s15 = scalar_lea.vmem %s14_s7, 256  ;;  %p93_p4 = scmp.lt.s32.totalorder %s14_s7, %s14_s7 }
   0x9   :  { %p89_p3 = scmp.ne.s32.totalorder %s14_s7, %s88_s15  ;;  %p94_p5 = scmp.lt.s32.totalorder %s88_s15, %s88_s15 }
   0xb   :  { %p95_p6 = por %p94_p5, %p93_p4 }
   0xd   :  { %p96_p7 = pnand %p95_p6, %p89_p3 }
   0xf   :  { %99 = shalt.err (!%p96_p7)
}
  0x10   :  { %s127_s16 = smov 128   ;;  %s128_s17 = smov 8  }
  0x11   :  { %19 = dma.hbm_to_vmem [thread:$0]  %s190_s0, 256, %s14_s7, [#allocation3], %s127_s16, %s127_s16, %s128_s17  }
  0x12   :  { %122 = dma.done.wait [#allocation3], 256  }
  0x13   :  { %123 = vsyncadd [#allocation3], 4294967040  ;;  %v26_v0 = vlaneseq  ;;  %s129_s20 = smov [#allocation5]   ;;  %v23_v2 = vld [vmem:[#allocation2] ss:$4 sm:$0x3] }
  0x14   :  { %s62_s21 = sshll.u32 %s129_s20, 4  ;;  %v25_v3 = vld [vmem:[#allocation2 + $0x8] ss:$4 sm:$0x3]  ;;  %s63_s21 = int_to_ptr.vmem [resolvable:$true] %s62_s21 }
  0x15   :  { %vm155_vm0 = vcmp.lt.s32.totalorder %v26_v0, 256  ;;  %v34_v4 = vld [vmem:[#allocation2 + $0x1] ss:$4 sm:$0x3]  ;;  %s100_s0 = scalar_lea.vmem %s63_s21, 256  ;;  %p105_p9 = scmp.lt.s32.totalorder %s63_s21, %s63_s21 }
  0x16   :  { %30 = vst.msk [vmem:[#allocation5] ss:$4 sm:$0x3] %vm155_vm0, %v23_v2  ;;  %32 = vst.msk [vmem:[#allocation5 + $0x8] ss:$4 sm:$0x3] %vm155_vm0, %v25_v3  ;;  %p101_p8 = scmp.ne.s32.totalorder %s63_s21, %s100_s0  ;;  %p106_p10 = scmp.lt.s32.totalorder %s100_s0, %s100_s0 }
  0x17   :  { %v36_v5 = vld [vmem:[#allocation2 + $0x9] ss:$4 sm:$0x3]  ;;  %38 = vst.msk [vmem:[#allocation5 + $0x2] ss:$4 sm:$0x3] %vm155_vm0, %v34_v4 }
  0x18   :  { %40 = vst.msk [vmem:[#allocation5 + $0xa] ss:$4 sm:$0x3] %vm155_vm0, %v36_v5  ;;  %v42_v6 = vld [vmem:[#allocation2 + $0x2] ss:$4 sm:$0x3]  ;;  %p107_p11 = por %p106_p10, %p105_p9 }
  0x19   :  { %v44_v7 = vld [vmem:[#allocation2 + $0xa] ss:$4 sm:$0x3]  ;;  %46 = vst.msk [vmem:[#allocation5 + $0x1] ss:$4 sm:$0x3] %vm155_vm0, %v42_v6 }
  0x1a   :  { %48 = vst.msk [vmem:[#allocation5 + $0x9] ss:$4 sm:$0x3] %vm155_vm0, %v44_v7  ;;  %v50_v8 = vld [vmem:[#allocation2 + $0x3] ss:$4 sm:$0x3]  ;;  %p108_p12 = pnand %p107_p11, %p101_p8 }
  0x1b   :  { %v52_v9 = vld [vmem:[#allocation2 + $0xb] ss:$4 sm:$0x3]  ;;  %54 = vst.msk [vmem:[#allocation5 + $0x3] ss:$4 sm:$0x3] %vm155_vm0, %v50_v8 }
  0x1c   :  { %56 = vst.msk [vmem:[#allocation5 + $0xb] ss:$4 sm:$0x3] %vm155_vm0, %v52_v9 }
  0x1d   :  { %111 = shalt.err (!%p108_p12)
}
  0x1e   :  { %s112_s24 = scalar_lea.hbm %s191_s1, 256 }
  0x1f   :  { %p113_p13 = scmp.ne.s32.totalorder %s191_s1, %s112_s24  ;;  %p116_p0 = scmp.lt.u32.totalorder %s112_s24, %s191_s1 }
  0x21   :  { %p118_p1 = pnand %p116_p0, %p113_p13 }
  0x23   :  { %121 = shalt.err (!%p118_p1)
}
  0x24   :  { %68 = dma.vmem_to_hbm [thread:$0]  %s63_s21, 256, %s191_s1, [#allocation4], %s127_s16, %s127_s16, %s128_s17  }
  0x25   :  { %124 = dma.done.wait [#allocation4], 256  }
  0x26   :  { %125 = vsyncadd [#allocation4], 4294967040 }
  0x27   :  { %72 = vsyncpa [#allocation3], 1 }
  0x28   :  { %73 = vsyncpa [#allocation4], 1 }

</bundles_post_ra>
